<compile_context>
chip_gen: v6e
topology: v6e:2x2x1
jax: 0.10.0
libtpu: 0.0.40
codegen_flags: <defaults>
</compile_context>

<pallas_src>
import jax
import jax.numpy as jnp
from jax.experimental import pallas as pl
from jax.experimental.pallas import tpu as pltpu


def _make_partial_kernel(C, tc, needs_mask):
    """Build the per-tile kernel; C / tc / needs_mask are static."""

    def kernel(out_ref, lab_ref, w_ref, part_ref):
        # out_ref : (tb, tc, HW)    native storage dtype
        # lab_ref : (tb, 1,  HW)    native storage dtype
        # w_ref   : (tb, 1,  HW)    f32, = 1 / (1 - label + 0.1)
        # part_ref: (1, 1, 1, HW)   f32 lane-dense partial sums
        x = out_ref[...].astype(jnp.float32)
        lab = lab_ref[...].astype(jnp.float32)
        w = w_ref[...]

        # per-(b, c) spatial max (matches torch.max over dims 2 then 3)
        row_max = jnp.max(x, axis=-1, keepdims=True)              # (tb, tc, 1)
        if needs_mask:
            cb = pl.program_id(1)
            ch = cb * tc + jax.lax.broadcasted_iota(jnp.int32, row_max.shape, 1)
            valid = ch < C                                         # (tb, tc, 1)
            # padded channels: neutralize the max so no inf/NaN leaks in.
            row_max = jnp.where(valid, row_max, jnp.float32(1.0))
        inv_max = 1.0 / row_max                                    # tc exact recips

        diff = x * inv_max - lab                                   # (tb, tc, HW)
        term = diff * diff * w                                     # (tb, tc, HW)
        if needs_mask:
            term = jnp.where(valid, term, jnp.float32(0.0))

        # sublane-direction partial reduce -> lane-dense (1, 1, HW) row.
        part_ref[0] = jnp.sum(term, axis=(0, 1), keepdims=True)

    return kernel


def _vmem_limit_bytes():
    """Generation-aware scoped VMEM limit (conservative if info unavailable)."""
    cap = None
    try:
        cap = pltpu.get_tpu_info().vmem_capacity_bytes
    except Exception:
        cap = None
    if cap is not None and cap >= 96 * 1024 * 1024:
        # v5e / v6e: 128 MiB physical VMEM -> raise the scoped limit for big tiles.
        return 64 * 1024 * 1024
    # v7x (64 MiB per TC) or unknown chip -> stay within the 32 MiB scoped default.
    return 32 * 1024 * 1024


def _choose_tiles(B, C, HW, itemsize, vmem_limit):
    """Pick (tb, tc) batch/channel tile sizes.

    Per-step working set ~= 2 double-buffered storage-dtype input buffers plus
    ~3 full-tile f32 intermediates (upcast, diff, term); keep it near half the
    scoped VMEM limit.  This is dtype-aware (bf16 gets more elements per tile)
    and lands DMA'd bytes per step in the ~2-8 MiB sweet spot per generation.
    """
    per_elem = 2 * itemsize + 12
    max_elems = max(HW, int(0.55 * vmem_limit) // per_elem)
    max_rows = max(1, max_elems // HW)

    if C <= max_rows:
        tc = C
    else:
        tc = (max_rows // 8) * 8          # multiple of 8: clean sublane tiling
        if tc == 0:
            # even 8 rows overshoot the budget; overshoot slightly rather than
            # emit a degenerate / (8,128)-violating tile.
            tc = min(C, 8)
    # TODO(synk): if a single (1, HW) row ever exceeds VMEM, the spatial max
    # needs a two-pass / carried-max tiling over HW.

    tb = 1
    if tc >= C:
        tc = C
        tb_max = max(1, max_elems // (C * HW))
        tb = max(d for d in range(1, B + 1) if B % d == 0 and d <= tb_max)

    # v7x megacore: if a non-trivial problem would be a single grid step, split
    # it so both TensorCores get work (harmless on 1-TC chips).
    total_bytes = B * C * HW * itemsize
    if tb >= B and tc >= C and total_bytes >= (1 << 19):
        if B >= 2 and B % 2 == 0:
            tb = B // 2
        elif C >= 16 and C % 16 == 0:
            tc = C // 2

    return tb, tc


def mod_mse_loss(outputs, label, *, _tile_override=None):
    """outputs: (B,C,H,W) array or [output, prior]; label: (B,H,W).
    Returns (loss_scalar, None) matching the PyTorch module."""
    if isinstance(outputs, (list, tuple)):
        output, prior = outputs
    else:
        output, prior = outputs, None

    B, C, H, W = output.shape
    HW = H * W

    # Free reshapes only — no dtype conversion / broadcast materialisation in HBM.
    out3d = output.reshape(B, C, HW)
    lab3d = label.reshape(B, 1, HW)
    # Hoisted weight reciprocal: computed once per element here instead of once
    # per channel tile inside the kernel (exact divide, done in f32).
    w3d = 1.0 / (1.0 - lab3d.astype(jnp.float32) + 0.1)

    vmem_limit = _vmem_limit_bytes()
    itemsize = jnp.dtype(output.dtype).itemsize
    if _tile_override is not None:
        tb, tc = _tile_override
    else:
        tb, tc = _choose_tiles(B, C, HW, itemsize, vmem_limit)

    gb = B // tb
    gc = pl.cdiv(C, tc)
    needs_mask = (C % tc) != 0

    kernel = _make_partial_kernel(C, tc, needs_mask)

    partials = pl.pallas_call(
        kernel,
        out_shape=jax.ShapeDtypeStruct((gb, gc, 1, HW), jnp.float32),
        grid_spec=pltpu.PrefetchScalarGridSpec(
            num_scalar_prefetch=0,
            grid=(gb, gc),
            in_specs=[
                pl.BlockSpec((tb, tc, HW), lambda b, cb: (b, cb, 0)),
                # label / weight: same block for every channel tile of a batch
                # tile -> fetched once per batch tile, no HBM-side broadcast.
                pl.BlockSpec((tb, 1, HW), lambda b, cb: (b, 0, 0)),
                pl.BlockSpec((tb, 1, HW), lambda b, cb: (b, 0, 0)),
            ],
            out_specs=pl.BlockSpec((1, 1, 1, HW), lambda b, cb: (b, cb, 0, 0)),
        ),
        compiler_params=pltpu.CompilerParams(
            dimension_semantics=("parallel", "parallel"),
            vmem_limit_bytes=vmem_limit,
        ),
    )(out3d, lab3d, w3d)

    mse = jnp.sum(partials) / (B * C * HW)

    loss = mse
    if prior is not None:
        Hp, Wp = prior.shape[-2], prior.shape[-1]
        # Tiny independent reduction over a (B,1,H,W)-sized prior; plain JAX.
        # TODO(synk): if a production `prior` is output-sized, fold sum(prior**2)
        # into the pallas_call to avoid a second full HBM pass.
        reg = jnp.sum(jnp.square(prior.astype(jnp.float32))) / (Hp * Wp)
        loss = reg + mse
    return loss, None


def _reference(output, label, prior):
    """Plain-JAX reference mirroring the PyTorch forward (all math in f32)."""
    output = output.astype(jnp.float32)
    label = label.astype(jnp.float32)
    omax = jnp.max(output, axis=(2, 3), keepdims=True)
    lab = label[:, None, :, :]
    mse = jnp.mean((output / omax - lab) ** 2 / (1.0 - lab + 0.1))
    if prior is None:
        return mse
    prior = prior.astype(jnp.float32)
    Hp, Wp = prior.shape[-2], prior.shape[-1]
    return jnp.sum(prior ** 2) / (Hp * Wp) + mse


if __name__ == "__main__":
    key = jax.random.PRNGKey(0)
    k1, k2, k3, k4, k5 = jax.random.split(key, 5)

    # --- main test: f32 storage, single-step grid (batch+channel blocked) ---
    B, C, H, W = 2, 4, 16, 16
    output = jax.random.uniform(k1, (B, C, H, W), jnp.float32, minval=0.05, maxval=1.0)
    label = jax.random.uniform(k2, (B, H, W), jnp.float32, minval=0.0, maxval=0.9)
    prior = jax.random.uniform(k3, (B, 1, H, W), jnp.float32, minval=-1.0, maxval=1.0)

    loss, aux = mod_mse_loss([output, prior], label)
    loss = jax.block_until_ready(loss)
    ref = _reference(output, label, prior)
    assert aux is None
    assert jnp.allclose(loss, ref, rtol=1e-5, atol=1e-5), (loss, ref)

    # --- bf16 storage path: HBM stays bf16, kernel upcasts to f32 ---
    out_bf = output.astype(jnp.bfloat16)
    lab_bf = label.astype(jnp.bfloat16)
    pri_bf = prior.astype(jnp.bfloat16)
    loss_bf, _ = mod_mse_loss([out_bf, pri_bf], lab_bf)
    loss_bf = jax.block_until_ready(loss_bf)
    ref_bf = _reference(out_bf, lab_bf, pri_bf)
    assert jnp.allclose(loss_bf, ref_bf, rtol=1e-4, atol=1e-4), (loss_bf, ref_bf)

    # --- masked multi-block path: C not divisible by tc (tc=8, C=12) ---
    B2, C2, H2, W2 = 2, 12, 8, 8
    out2 = jax.random.uniform(k4, (B2, C2, H2, W2), jnp.float32, minval=0.05, maxval=1.0)
    lab2 = jax.random.uniform(k5, (B2, H2, W2), jnp.float32, minval=0.0, maxval=0.9)
    loss2, _ = mod_mse_loss(out2, lab2, _tile_override=(1, 8))
    loss2 = jax.block_until_ready(loss2)
    ref2 = _reference(out2, lab2, None)
    assert jnp.allclose(loss2, ref2, rtol=1e-5, atol=1e-5), (loss2, ref2)

    print("KERNEL_OK")
</pallas_src>

<mosaic_0001>
module attributes {stable_mosaic.version = 11 : i64} {
  func.func @kernel(%arg0: i32, %arg1: i32, %arg2: memref<2x4x256xf32, #tpu.memory_space<vmem>>, %arg3: memref<2x1x256xf32, #tpu.memory_space<vmem>>, %arg4: memref<2x1x256xf32, #tpu.memory_space<vmem>>, %arg5: memref<1x1x1x256xf32, #tpu.memory_space<vmem>>) attributes {dimension_semantics = [#tpu.dimension_semantics<parallel>, #tpu.dimension_semantics<parallel>], iteration_bounds = array<i64: 1, 1>, scalar_prefetch = 0 : i64, scratch_operands = 0 : i64, tpu.core_type = #tpu.core_type<tc>, window_params = [{transform_indices = @transform_0, window_bounds = array<i64: 2, 4, 256>}, {transform_indices = @transform_1, window_bounds = array<i64: 2, 1, 256>}, {transform_indices = @transform_2, window_bounds = array<i64: 2, 1, 256>}, {transform_indices = @transform_3, window_bounds = array<i64: 1, 1, 1, 256>}]} {
    %c0 = arith.constant 0 : index
    %c0_0 = arith.constant 0 : index
    %c0_1 = arith.constant 0 : index
    %0 = vector.load %arg2[%c0, %c0_0, %c0_1] : memref<2x4x256xf32, #tpu.memory_space<vmem>>, vector<2x4x256xf32>
    %c0_2 = arith.constant 0 : index
    %c0_3 = arith.constant 0 : index
    %c0_4 = arith.constant 0 : index
    %1 = vector.load %arg3[%c0_2, %c0_3, %c0_4] : memref<2x1x256xf32, #tpu.memory_space<vmem>>, vector<2x1x256xf32>
    %c0_5 = arith.constant 0 : index
    %c0_6 = arith.constant 0 : index
    %c0_7 = arith.constant 0 : index
    %2 = vector.load %arg4[%c0_5, %c0_6, %c0_7] : memref<2x1x256xf32, #tpu.memory_space<vmem>>, vector<2x1x256xf32>
    %cst = arith.constant dense<0xFF800000> : vector<2x4xf32>
    %3 = vector.multi_reduction <maximumf>, %0, %cst [2] : vector<2x4x256xf32> to vector<2x4xf32>
    %4 = vector.shape_cast %3 : vector<2x4xf32> to vector<2x4x1xf32>
    %cst_8 = arith.constant 1.000000e+00 : f32
    %5 = vector.broadcast %cst_8 : f32 to vector<2x4x1xf32>
    %6 = arith.divf %5, %4 : vector<2x4x1xf32>
    %7 = vector.broadcast %6 : vector<2x4x1xf32> to vector<2x4x256xf32>
    %8 = arith.mulf %0, %7 : vector<2x4x256xf32>
    %9 = vector.broadcast %1 : vector<2x1x256xf32> to vector<2x4x256xf32>
    %10 = arith.subf %8, %9 : vector<2x4x256xf32>
    %11 = arith.mulf %10, %10 : vector<2x4x256xf32>
    %12 = vector.broadcast %2 : vector<2x1x256xf32> to vector<2x4x256xf32>
    %13 = arith.mulf %11, %12 : vector<2x4x256xf32>
    %cst_9 = arith.constant dense<0.000000e+00> : vector<256xf32>
    %14 = vector.multi_reduction <add>, %13, %cst_9 [0, 1] : vector<2x4x256xf32> to vector<256xf32>
    %15 = vector.shape_cast %14 : vector<256xf32> to vector<1x1x256xf32>
    %c0_10 = arith.constant 0 : index
    %c0_11 = arith.constant 0 : index
    %c0_12 = arith.constant 0 : index
    %c0_13 = arith.constant 0 : index
    %16 = vector.load %arg5[%c0_10, %c0_11, %c0_12, %c0_13] : memref<1x1x1x256xf32, #tpu.memory_space<vmem>>, vector<1x1x1x256xf32>
    %17 = vector.shape_cast %16 : vector<1x1x1x256xf32> to vector<1x1x256xf32>
    %18 = vector.shape_cast %15 : vector<1x1x256xf32> to vector<1x1x1x256xf32>
    tpu.vector_store %arg5[%c0_10, %c0_11, %c0_12, %c0_13], %18 {strides = array<i32>} : memref<1x1x1x256xf32, #tpu.memory_space<vmem>>, vector<1x1x1x256xf32>,
    return
  }
  func.func @transform_0(%arg0: i32, %arg1: i32) -> (i32, i32, i32) {
    %c0_i32 = arith.constant 0 : i32
    %c0_i32_0 = arith.constant 0 : i32
    return %arg0, %arg1, %c0_i32 : i32, i32, i32
  }
  func.func @transform_1(%arg0: i32, %arg1: i32) -> (i32, i32, i32) {
    %c0_i32 = arith.constant 0 : i32
    %c0_i32_0 = arith.constant 0 : i32
    %c0_i32_1 = arith.constant 0 : i32
    return %arg0, %c0_i32, %c0_i32_0 : i32, i32, i32
  }
  func.func @transform_2(%arg0: i32, %arg1: i32) -> (i32, i32, i32) {
    %c0_i32 = arith.constant 0 : i32
    %c0_i32_0 = arith.constant 0 : i32
    %c0_i32_1 = arith.constant 0 : i32
    return %arg0, %c0_i32, %c0_i32_0 : i32, i32, i32
  }
  func.func @transform_3(%arg0: i32, %arg1: i32) -> (i32, i32, i32, i32) {
    %c0_i32 = arith.constant 0 : i32
    %c0_i32_0 = arith.constant 0 : i32
    %c0_i32_1 = arith.constant 0 : i32
    return %arg0, %arg1, %c0_i32, %c0_i32_0 : i32, i32, i32, i32
  }
}

</mosaic_0001>

<bundles_post_ra>
// kernel: tpu_custom_call.1
= control target key start
LH: loop header
LB: loop body
LE: loop exit
PB: predicated region body
PF: predicated region fallthrough
CT: control target
= control target key end

     0   :  { %8 = vsyncpa [#allocation3], 0  ;;  %s370_s0 = inlined_call_operand.hbm [shape: f32[2,4,256], index: 0, kind: input, shape index: {}]   ;;  %s371_s1 = inlined_call_operand.hbm [shape: f32[2,1,256], index: 1, kind: input, shape index: {}]   ;;  %s372_s2 = inlined_call_operand.hbm [shape: f32[2,1,256], index: 2, kind: input, shape index: {}]   ;;  %s373_s3 = inlined_call_operand.hbm [shape: f32[1,1,1,256], index: 3, kind: output, shape index: {}]  }
   0x1   :  { %9 = vsyncpa [#allocation6], 0 }
   0x2   :  { %10 = vsyncpa [#allocation4], 0  ;;  %s318_s12 = smov [#allocation5]  }
   0x3   :  { %s28_s13 = sshll.u32 %s318_s12, 4  ;;  %s29_s13 = int_to_ptr.vmem [resolvable:$true] %s28_s13 }
   0x4   :  { %s240_s14 = scalar_lea.vmem %s29_s13, 64  ;;  %p245_p1 = scmp.lt.s32.totalorder %s29_s13, %s29_s13 }
   0x5   :  { %p241_p0 = scmp.ne.s32.totalorder %s29_s13, %s240_s14  ;;  %p246_p2 = scmp.lt.s32.totalorder %s240_s14, %s240_s14 }
   0x7   :  { %p247_p3 = por %p246_p2, %p245_p1 }
   0x9   :  { %p248_p4 = pnand %p247_p3, %p241_p0 }
   0xb   :  { %251 = shalt.err (!%p248_p4)
}
   0xc   :  { %s319_s15 = smov 32   ;;  %s320_s16 = smov 2  }
   0xd   :  { %34 = dma.hbm_to_vmem [thread:$0]  %s371_s1, 64, %s29_s13, [#allocation6], %s319_s15, %s319_s15, %s320_s16  }
   0xe   :  { %s321_s19 = smov [#allocation2]  }
   0xf   :  { %s16_s20 = sshll.u32 %s321_s19, 4  ;;  %s17_s20 = int_to_ptr.vmem [resolvable:$true] %s16_s20 }
  0x10   :  { %s260_s21 = scalar_lea.vmem %s17_s20, 256  ;;  %p265_p6 = scmp.lt.s32.totalorder %s17_s20, %s17_s20 }
  0x11   :  { %p261_p5 = scmp.ne.s32.totalorder %s17_s20, %s260_s21  ;;  %p266_p7 = scmp.lt.s32.totalorder %s260_s21, %s260_s21 }
  0x13   :  { %p267_p8 = por %p266_p7, %p265_p6 }
  0x15   :  { %p268_p9 = pnand %p267_p8, %p261_p5 }
  0x17   :  { %271 = shalt.err (!%p268_p9)
}
  0x18   :  { %s322_s22 = smov 128   ;;  %s323_s23 = smov 8  }
  0x19   :  { %22 = dma.hbm_to_vmem [thread:$0]  %s370_s0, 256, %s17_s20, [#allocation3], %s322_s22, %s322_s22, %s323_s23  }
  0x1a   :  { %s324_s26 = smov [#allocation7]  }
  0x1b   :  { %s40_s27 = sshll.u32 %s324_s26, 4  ;;  %s41_s27 = int_to_ptr.vmem [resolvable:$true] %s40_s27 }
  0x1c   :  { %s280_s1 = scalar_lea.vmem %s41_s27, 64  ;;  %p285_p11 = scmp.lt.s32.totalorder %s41_s27, %s41_s27 }
  0x1d   :  { %p281_p10 = scmp.ne.s32.totalorder %s41_s27, %s280_s1  ;;  %p286_p12 = scmp.lt.s32.totalorder %s280_s1, %s280_s1 }
  0x1f   :  { %p287_p13 = por %p286_p12, %p285_p11 }
  0x21   :  { %p288_p0 = pnand %p287_p13, %p281_p10 }
  0x23   :  { %291 = shalt.err (!%p288_p0)
}
  0x24   :  { %46 = dma.hbm_to_vmem [thread:$0]  %s372_s2, 64, %s41_s27, [#allocation6], %s319_s15, %s319_s15, %s320_s16  }
  0x25   :  { %312 = dma.done.wait [#allocation3], 256  }
  0x26   :  { %313 = vsyncadd [#allocation3], 4294967040 }
  0x27   :  { %314 = dma.done.wait [#allocation6], 128  }
  0x28   :  { %315 = vsyncadd [#allocation6], 4294967168  ;;  %vm68_vm0 = vcmask 1043456   ;;  %v56_v0 = vld [vmem:[#allocation2] sm:$0xff]  ;;  %v57_v1 = vld [vmem:[#allocation2 + $0x8] sm:$0xff]  ;;  %v88_v10 = vlaneseq  ;;  %s327_s0 = smov [#allocation8]  }
  0x29   :  { %v64_v2 = vcombine.high %v56_v0, %v56_v0  ;;  %v69_v3 = vsel %vm68_vm0, %v56_v0, -inf  ;;  %v65_v4 = vcombine.high %v57_v1, %v57_v1  ;;  %v74_v6 = vsel %vm68_vm0, %v57_v1, -inf  ;;  %v58_v19 = vld [vmem:[#allocation5] sm:$0x3]  ;;  %v59_v20 = vld [vmem:[#allocation5 + $0x2] sm:$0x3] }
  0x2a   :  { %v325_v12 = vmov 839922192   ;;  %v89_v14 = vshrl.u32 %v88_v10, 7  ;;  %v60_v21 = vld [vmem:[#allocation7] sm:$0x3]  ;;  %s206_s2 = sshll.u32 %s327_s0, 4  ;;  %s207_s2 = int_to_ptr.vmem [resolvable:$true] %s206_s2 }
  0x2b   :  { %v70_v5 = vsel %vm68_vm0, %v64_v2, -inf  ;;  %v75_v7 = vsel %vm68_vm0, %v65_v4, -inf  ;;  %v86_v13 = vunpack.c.l.s4 %v325_v12  ;;  %v61_v32 = vld [vmem:[#allocation7 + $0x2] sm:$0x3]  ;;  %v326_v61 = vmov 1966171168   ;;  %p297_p2 = scmp.lt.s32.totalorder %s207_s2, %s207_s2 }
  0x2c   :  { %v71_v8 = vmax.f32 %v69_v3, %v70_v5  ;;  %v76_v9 = vmax.f32 %v74_v6, %v75_v7  ;;  %v107_v17 = vsub.s32 0, %v89_v14  ;;  %v111_v18 = vsub.s32 1, %v89_v14  ;;  %s292_s30 = scalar_lea.vmem %s207_s2, 32 }
  0x2d   :  { %v87_v16 = vunpack.c.0.s8 %v86_v13  ;;  %v181_v62 = vunpack.c.l.s4 %v326_v61  ;;  %vm197_vm1 = vcmp.lt.s32.totalorder %v88_v10, 256  ;;  %p293_p1 = scmp.ne.s32.totalorder %s207_s2, %s292_s30  ;;  %p298_p3 = scmp.lt.s32.totalorder %s292_s30, %s292_s30 }
  0x2e   :  { %72 = vmax.xlane.f32.xlu0 %v71_v8  ;;  %v108_v23 = vrot.slane %v58_v19, %v107_v17  ;;  %v112_v24 = vrot.slane %v58_v19, %v111_v18  ;;  %v116_v26 = vrot.slane %v59_v20, %v107_v17  ;;  %v120_v27 = vrot.slane %v59_v20, %v111_v18 }
  0x2f   :  { %v90_v22 = vsub.s32 %v87_v16, %v89_v14  ;;  %v134_v28 = vrot.slane %v60_v21, %v107_v17  ;;  %v138_v29 = vrot.slane %v60_v21, %v111_v18  ;;  %v142_v39 = vrot.slane %v61_v32, %v107_v17  ;;  %p299_p4 = por %p298_p3, %p297_p2 }
  0x30   :  { %v121_v31 = vcombine.low %v108_v23, %v112_v24  ;;  %v122_v35 = vcombine.low %v116_v26, %v120_v27  ;;  %v146_v40 = vrot.slane %v61_v32, %v111_v18  ;;  %v182_v3 = vunpack.c.0.s8 %v181_v62 }
  0x31   :  { %v147_v36 = vcombine.low %v134_v28, %v138_v29  ;;  %p300_p5 = pnand %p299_p4, %p293_p1 }
  0x32   :  { %77 = vmax.xlane.f32.xlu0 %v76_v9  ;;  %v148_v44 = vcombine.low %v142_v39, %v146_v40  ;;  %v185_v7 = vsub.s32 %v182_v3, %v89_v14 }
  0xb7   :  { %v73_v11 = vpop.xlane.xlu0 %72 }
  0xb8   :  { %228 = vrcp.f32 %v73_v11 }
  0xbb   :  { %v78_v15 = vpop.xlane.xlu0 %77 }
  0xbc   :  { %230 = vrcp.f32 %v78_v15 }
  0xc5   :  { %v229_v25 = vpop.eup %228 }
  0xc6   :  { %v91_v30 = vrot.slane %v229_v25, %v90_v22 }
  0xc8   :  { %v101_v33 = vmul.f32 %v91_v30, %v56_v0 }
  0xc9   :  { %v231_v34 = vpop.eup %230 }
  0xca   :  { %v98_v37 = vrot.slane %v231_v34, %v90_v22  ;;  %v125_v38 = vsub.f32 %v101_v33, %v121_v31 }
  0xcc   :  { %v102_v41 = vmul.f32 %v98_v37, %v57_v1  ;;  %v127_v42 = vmul.f32 %v125_v38, %v125_v38 }
  0xce   :  { %v126_v43 = vsub.f32 %v102_v41, %v122_v35  ;;  %v151_v45 = vmul.f32 %v147_v36, %v127_v42 }
  0xd0   :  { %v128_v46 = vmul.f32 %v126_v43, %v126_v43  ;;  %v155_v48 = vcombine.high %v151_v45, %v151_v45  ;;  %v159_v50 = vsel %vm68_vm0, %v151_v45, 0.0 }
  0xd2   :  { %v152_v47 = vmul.f32 %v148_v44, %v128_v46  ;;  %v168_v53 = vsel %vm68_vm0, %v155_v48, 0.0 }
  0xd4   :  { %v156_v49 = vcombine.high %v152_v47, %v152_v47  ;;  %v160_v51 = vsel %vm68_vm0, %v152_v47, 0.0 }
  0xd5   :  { %v161_v52 = vadd.f32 %v160_v51, %v159_v50 }
  0xd6   :  { %v169_v54 = vsel %vm68_vm0, %v156_v49, 0.0 }
  0xd7   :  { %v162_v55 = vrot.slane %v161_v52, 4  ;;  %v170_v56 = vadd.f32 %v169_v54, %v168_v53 }
  0xd9   :  { %v163_v57 = vadd.f32 %v162_v55, %v161_v52  ;;  %v171_v58 = vrot.slane %v170_v56, 4 }
  0xdb   :  { %v164_v59 = vrot.slane %v163_v57, 2  ;;  %v172_v60 = vadd.f32 %v171_v58, %v170_v56 }
  0xdd   :  { %v165_v63 = vadd.f32 %v164_v59, %v163_v57  ;;  %v173_v0 = vrot.slane %v172_v60, 2 }
  0xdf   :  { %v166_v1 = vrot.slane %v165_v63, 1  ;;  %v174_v2 = vadd.f32 %v173_v0, %v172_v60 }
  0xe1   :  { %v175_v4 = vrot.slane %v174_v2, 1  ;;  %v167_v5 = vadd.f32 %v166_v1, %v165_v63 }
  0xe3   :  { %v176_v6 = vadd.f32 %v175_v4, %v174_v2 }
  0xe5   :  { %v179_v8 = vcombine.low %v167_v5, %v176_v6 }
  0xe7   :  { %v186_v9 = vrot.slane %v179_v8, %v185_v7 }
  0xe9   :  { %v193_v11 = vrot.slane %v186_v9, %v185_v7 }
  0xeb   :  { %199 = vst.msk [vmem:[#allocation8] sm:$0x3] %vm197_vm1, %v193_v11 }
  0xec   :  { %303 = shalt.err (!%p300_p5)
}
  0xed   :  { %209 = dma.vmem_to_hbm [thread:$0]  %s207_s2, 32, %s373_s3, [#allocation4]  }
  0xee   :  { %316 = dma.done.wait [#allocation4], 32  }
  0xef   :  { %317 = vsyncadd [#allocation4], 4294967264 }
  0xf0   :  { %213 = vsyncpa [#allocation3], 1 }
  0xf1   :  { %214 = vsyncpa [#allocation6], 1 }
  0xf2   :  { %215 = vsyncpa [#allocation4], 1 }

</bundles_post_ra>
